<compile_context>
chip_gen: v7x
topology: tpu7x:2x2x1
jax: 0.10.0
libtpu: 0.0.40
codegen_flags: <defaults>
</compile_context>

<pallas_src>
import jax
import jax.numpy as jnp
from jax.experimental import pallas as pl
from jax.experimental.pallas import tpu as pltpu


def _attention_kernel(mask_ref, x_ref, inv_len_ref, wt_ref, b_ref,
                      pred_ref, attn_ref, acc_ref):
    # mask_ref:    (TS, B)      f32, 1.0 where padded
    # x_ref:       (TS, B, D)   f32
    # inv_len_ref: (B, 1)       f32, 1 / number-of-valid-positions (host precomputed)
    # wt_ref:      (D, O_pad)   f32, classifier weight transposed + lane-padded
    # b_ref:       (1, O_pad)   f32
    # pred_ref:    (B, O_pad)   f32 (resident across the S grid axis)
    # attn_ref:    (B, D)       f32 (resident across the S grid axis)
    # acc_ref:     (B, D)       f32 VMEM scratch accumulator
    @pl.when(pl.program_id(0) == 0)
    def _init():
        acc_ref[...] = jnp.zeros_like(acc_ref)

    not_mask = 1.0 - mask_ref[...]                     # (TS, B)
    x = x_ref[...]                                     # (TS, B, D)
    # Masked partial sum over this sequence tile.
    # TODO(synk): at large S*D this reduction could be moved to the MXU via a
    # batched einsum; at these shapes the VPU form is simpler and just as fast.
    acc_ref[...] += jnp.sum(not_mask[:, :, None] * x, axis=0)   # (B, D)

    @pl.when(pl.program_id(0) == pl.num_programs(0) - 1)
    def _finalize():
        mean_x = acc_ref[...] * inv_len_ref[...]       # (B, D) masked mean
        attn_ref[...] = mean_x
        pred_ref[...] = (
            jnp.dot(mean_x, wt_ref[...], preferred_element_type=jnp.float32)
            + b_ref[...]
        )


def _pick_seq_tile(S, B, D, budget_bytes):
    """Largest sequence tile whose double-buffered x tile fits the VMEM budget."""
    bytes_per_row = B * D * 4                       # f32
    rows = max(1, budget_bytes // (2 * bytes_per_row))  # x2: double buffering
    if rows >= S:
        return S
    return max(8, (rows // 8) * 8)                  # keep sublane (8) alignment


def attention_model_q1(x, mask_pad, weight, bias, *,
                       seq_tile=None, vmem_budget_bytes=8 << 20):
    """x: (S, B, D) f32, mask_pad: (S, B) bool (True = padded),
    weight: (O, D), bias: (O,).  Returns (pred (B, O), attn (B, D))."""
    S, B, D = x.shape
    O = weight.shape[0]

    # --- host-side precompute (tiny, one-time) -------------------------------
    not_mask_f = (~mask_pad).astype(jnp.float32)            # (S, B)
    x_len = jnp.sum(not_mask_f, axis=0)                     # (B,)
    inv_len = (1.0 / x_len).reshape(B, 1)                   # (B, 1); NaN/Inf if a
    mask_f = mask_pad.astype(jnp.float32)                   # column is fully padded,
                                                            # matching PyTorch.

    # Lane-dense classifier path: pad out_dim up to a multiple of 128 lanes.
    O_pad = max(128, ((O + 127) // 128) * 128)
    w_t = jnp.pad(weight.T.astype(jnp.float32), ((0, 0), (0, O_pad - O)))  # (D, O_pad)
    b_pad = jnp.pad(bias.astype(jnp.float32).reshape(1, O), ((0, 0), (0, O_pad - O)))

    # --- sequence tiling ------------------------------------------------------
    if seq_tile is None:
        seq_tile = _pick_seq_tile(S, B, D, vmem_budget_bytes)
    TS = min(int(seq_tile), S)
    if TS < S:
        TS = max(8, (TS // 8) * 8)                  # (8,128) constraint on the mask block
    num_tiles = -(-S // TS)
    S_pad = num_tiles * TS
    if S_pad != S:
        # Padded positions are marked as pad (mask = 1) so they contribute zero.
        x = jnp.pad(x, ((0, S_pad - S), (0, 0), (0, 0)))
        mask_f = jnp.pad(mask_f, ((0, S_pad - S), (0, 0)), constant_values=1.0)

    grid_spec = pltpu.PrefetchScalarGridSpec(
        num_scalar_prefetch=0,
        grid=(num_tiles,),
        in_specs=[
            pl.BlockSpec((TS, B), lambda i: (i, 0)),          # mask tile
            pl.BlockSpec((TS, B, D), lambda i: (i, 0, 0)),    # x tile
            pl.BlockSpec((B, 1), lambda i: (0, 0)),           # inv_len (resident)
            pl.BlockSpec((D, O_pad), lambda i: (0, 0)),       # weight^T (resident)
            pl.BlockSpec((1, O_pad), lambda i: (0, 0)),       # bias (resident)
        ],
        out_specs=[
            pl.BlockSpec((B, O_pad), lambda i: (0, 0)),       # pred (resident)
            pl.BlockSpec((B, D), lambda i: (0, 0)),           # attn (resident)
        ],
        scratch_shapes=[pltpu.VMEM((B, D), jnp.float32)],     # masked-sum accumulator
    )

    pred_pad, attn = pl.pallas_call(
        _attention_kernel,
        out_shape=(
            jax.ShapeDtypeStruct((B, O_pad), jnp.float32),
            jax.ShapeDtypeStruct((B, D), jnp.float32),
        ),
        grid_spec=grid_spec,
        compiler_params=pltpu.CompilerParams(
            dimension_semantics=("arbitrary",),               # reduction over S
        ),
    )(mask_f, x.astype(jnp.float32), inv_len, w_t, b_pad)

    return pred_pad[:, :O], attn


def reference(x, mask_pad, weight, bias):
    """Pure-JAX reference mirroring the PyTorch forward."""
    not_mask = (~mask_pad)[:, :, None].astype(jnp.float32)   # (S, B, 1)
    x_len = not_mask.sum(axis=0)                              # (B, 1)
    mean_x = (not_mask * x).sum(axis=0) / x_len               # (B, D)
    pred = mean_x @ weight.T + bias                           # (B, O)
    return pred, mean_x


if __name__ == "__main__":
    # Small shapes; seq_tile=8 forces a multi-step grid so the accumulator
    # init / accumulate / finalize path is actually exercised.
    S, B, D, O = 16, 2, 32, 8

    key = jax.random.PRNGKey(0)
    kx, kw, kb = jax.random.split(key, 3)
    x = jax.random.normal(kx, (S, B, D), dtype=jnp.float32)

    # nn.Linear(input_dim, out_dim) parameter shapes.
    weight = jax.random.normal(kw, (O, D), dtype=jnp.float32) * 0.1
    bias = jax.random.normal(kb, (O,), dtype=jnp.float32) * 0.1

    # Deterministic padding mask: True = padded. Per-batch valid lengths [16, 9].
    lengths = jnp.array([16, 9], dtype=jnp.int32)
    mask_pad = jnp.arange(S)[:, None] >= lengths[None, :]     # (S, B) bool

    pred, attn = attention_model_q1(x, mask_pad, weight, bias, seq_tile=8)
    pred = jax.block_until_ready(pred)
    attn = jax.block_until_ready(attn)

    pred_ref, attn_ref = reference(x, mask_pad, weight, bias)
    assert pred.shape == (B, O) and attn.shape == (B, D)
    assert jnp.allclose(pred, pred_ref, atol=1e-5, rtol=1e-5)
    assert jnp.allclose(attn, attn_ref, atol=1e-5, rtol=1e-5)

    print("KERNEL_OK")
</pallas_src>

<mosaic_0001>
module attributes {stable_mosaic.version = 11 : i64} {
  func.func @_attention_kernel(%arg0: i32, %arg1: memref<8x2xf32, #tpu.memory_space<vmem>>, %arg2: memref<8x2x32xf32, #tpu.memory_space<vmem>>, %arg3: memref<2x1xf32, #tpu.memory_space<vmem>>, %arg4: memref<32x128xf32, #tpu.memory_space<vmem>>, %arg5: memref<1x128xf32, #tpu.memory_space<vmem>>, %arg6: memref<2x128xf32, #tpu.memory_space<vmem>>, %arg7: memref<2x32xf32, #tpu.memory_space<vmem>>, %arg8: memref<2x32xf32, #tpu.memory_space<vmem>>) attributes {dimension_semantics = [#tpu.dimension_semantics<arbitrary>], iteration_bounds = array<i64: 2>, scalar_prefetch = 0 : i64, scratch_operands = 1 : i64, tpu.core_type = #tpu.core_type<tc>, window_params = [{transform_indices = @transform_0, window_bounds = array<i64: 8, 2>}, {transform_indices = @transform_1, window_bounds = array<i64: 8, 2, 32>}, {pipeline_mode = #tpu.pipeline_mode<synchronous>, transform_indices = @transform_2, window_bounds = array<i64: 2, 1>}, {pipeline_mode = #tpu.pipeline_mode<synchronous>, transform_indices = @transform_3, window_bounds = array<i64: 32, 128>}, {pipeline_mode = #tpu.pipeline_mode<synchronous>, transform_indices = @transform_4, window_bounds = array<i64: 1, 128>}, {pipeline_mode = #tpu.pipeline_mode<synchronous>, transform_indices = @transform_5, window_bounds = array<i64: 2, 128>}, {pipeline_mode = #tpu.pipeline_mode<synchronous>, transform_indices = @transform_6, window_bounds = array<i64: 2, 32>}]} {
    %c0_i32 = arith.constant 0 : i32
    %0 = arith.cmpi eq, %arg0, %c0_i32 : i32
    %1 = arith.extui %0 : i1 to i32
    %c0_i32_0 = arith.constant 0 : i32
    %2 = arith.cmpi ne, %1, %c0_i32_0 : i32
    scf.if %2 {
      %cst_11 = arith.constant 0.000000e+00 : f32
      %17 = vector.broadcast %cst_11 : f32 to vector<2x32xf32>
      %c0_12 = arith.constant 0 : index
      %c0_13 = arith.constant 0 : index
      %18 = vector.load %arg8[%c0_12, %c0_13] : memref<2x32xf32, #tpu.memory_space<vmem>>, vector<2x32xf32>
      tpu.vector_store %arg8[%c0_12, %c0_13], %17 {strides = array<i32>} : memref<2x32xf32, #tpu.memory_space<vmem>>, vector<2x32xf32>,
    } else {
    }
    %c0 = arith.constant 0 : index
    %c0_1 = arith.constant 0 : index
    %3 = vector.load %arg1[%c0, %c0_1] : memref<8x2xf32, #tpu.memory_space<vmem>>, vector<8x2xf32>
    %cst = arith.constant 1.000000e+00 : f32
    %4 = vector.broadcast %cst : f32 to vector<8x2xf32>
    %5 = arith.subf %4, %3 : vector<8x2xf32>
    %c0_2 = arith.constant 0 : index
    %c0_3 = arith.constant 0 : index
    %c0_4 = arith.constant 0 : index
    %6 = vector.load %arg2[%c0_2, %c0_3, %c0_4] : memref<8x2x32xf32, #tpu.memory_space<vmem>>, vector<8x2x32xf32>
    %c0_5 = arith.constant 0 : index
    %c0_6 = arith.constant 0 : index
    %7 = vector.load %arg8[%c0_5, %c0_6] : memref<2x32xf32, #tpu.memory_space<vmem>>, vector<2x32xf32>
    %8 = vector.shape_cast %5 : vector<8x2xf32> to vector<8x2x1xf32>
    %9 = vector.broadcast %8 : vector<8x2x1xf32> to vector<8x2x32xf32>
    %10 = arith.mulf %9, %6 : vector<8x2x32xf32>
    %cst_7 = arith.constant dense<0.000000e+00> : vector<2x32xf32>
    %11 = vector.multi_reduction <add>, %10, %cst_7 [0] : vector<8x2x32xf32> to vector<2x32xf32>
    %12 = arith.addf %7, %11 : vector<2x32xf32>
    %c0_8 = arith.constant 0 : index
    %c0_9 = arith.constant 0 : index
    %13 = vector.load %arg8[%c0_8, %c0_9] : memref<2x32xf32, #tpu.memory_space<vmem>>, vector<2x32xf32>
    tpu.vector_store %arg8[%c0_8, %c0_9], %12 {strides = array<i32>} : memref<2x32xf32, #tpu.memory_space<vmem>>, vector<2x32xf32>,
    %c1_i32 = arith.constant 1 : i32
    %14 = arith.cmpi eq, %arg0, %c1_i32 : i32
    %15 = arith.extui %14 : i1 to i32
    %c0_i32_10 = arith.constant 0 : i32
    %16 = arith.cmpi ne, %15, %c0_i32_10 : i32
    scf.if %16 {
      %c0_11 = arith.constant 0 : index
      %c0_12 = arith.constant 0 : index
      %17 = vector.load %arg8[%c0_11, %c0_12] : memref<2x32xf32, #tpu.memory_space<vmem>>, vector<2x32xf32>
      %c0_13 = arith.constant 0 : index
      %c0_14 = arith.constant 0 : index
      %18 = vector.load %arg3[%c0_13, %c0_14] : memref<2x1xf32, #tpu.memory_space<vmem>>, vector<2x1xf32>
      %19 = vector.broadcast %18 : vector<2x1xf32> to vector<2x32xf32>
      %20 = arith.mulf %17, %19 : vector<2x32xf32>
      %c0_15 = arith.constant 0 : index
      %c0_16 = arith.constant 0 : index
      %21 = vector.load %arg7[%c0_15, %c0_16] : memref<2x32xf32, #tpu.memory_space<vmem>>, vector<2x32xf32>
      tpu.vector_store %arg7[%c0_15, %c0_16], %20 {strides = array<i32>} : memref<2x32xf32, #tpu.memory_space<vmem>>, vector<2x32xf32>,
      %c0_17 = arith.constant 0 : index
      %c0_18 = arith.constant 0 : index
      %22 = vector.load %arg4[%c0_17, %c0_18] : memref<32x128xf32, #tpu.memory_space<vmem>>, vector<32x128xf32>
      %cst_19 = arith.constant dense<0.000000e+00> : vector<2x128xf32>
      %23 = tpu.matmul %20, %22, %cst_19 {dimension_numbers = #tpu.dot_dimension_numbers<[1], [0], [0], [1], [0, 0, 1, 1], [], []>} : vector<2x32xf32>, vector<32x128xf32>, vector<2x128xf32> -> vector<2x128xf32>
      %c0_20 = arith.constant 0 : index
      %c0_21 = arith.constant 0 : index
      %24 = vector.load %arg5[%c0_20, %c0_21] : memref<1x128xf32, #tpu.memory_space<vmem>>, vector<1x128xf32>
      %25 = vector.broadcast %24 : vector<1x128xf32> to vector<2x128xf32>
      %26 = arith.addf %23, %25 : vector<2x128xf32>
      %c0_22 = arith.constant 0 : index
      %c0_23 = arith.constant 0 : index
      %27 = vector.load %arg6[%c0_22, %c0_23] : memref<2x128xf32, #tpu.memory_space<vmem>>, vector<2x128xf32>
      tpu.vector_store %arg6[%c0_22, %c0_23], %26 {strides = array<i32>} : memref<2x128xf32, #tpu.memory_space<vmem>>, vector<2x128xf32>,
    } else {
    }
    return
  }
  func.func @transform_0(%arg0: i32) -> (i32, i32) {
    %c0_i32 = arith.constant 0 : i32
    %c0_i32_0 = arith.constant 0 : i32
    return %arg0, %c0_i32 : i32, i32
  }
  func.func @transform_1(%arg0: i32) -> (i32, i32, i32) {
    %c0_i32 = arith.constant 0 : i32
    %c0_i32_0 = arith.constant 0 : i32
    %c0_i32_1 = arith.constant 0 : i32
    return %arg0, %c0_i32, %c0_i32_0 : i32, i32, i32
  }
  func.func @transform_2(%arg0: i32) -> (i32, i32) {
    %c0_i32 = arith.constant 0 : i32
    %c0_i32_0 = arith.constant 0 : i32
    %c0_i32_1 = arith.constant 0 : i32
    return %c0_i32, %c0_i32_0 : i32, i32
  }
  func.func @transform_3(%arg0: i32) -> (i32, i32) {
    %c0_i32 = arith.constant 0 : i32
    %c0_i32_0 = arith.constant 0 : i32
    %c0_i32_1 = arith.constant 0 : i32
    return %c0_i32, %c0_i32_0 : i32, i32
  }
  func.func @transform_4(%arg0: i32) -> (i32, i32) {
    %c0_i32 = arith.constant 0 : i32
    %c0_i32_0 = arith.constant 0 : i32
    %c0_i32_1 = arith.constant 0 : i32
    return %c0_i32, %c0_i32_0 : i32, i32
  }
  func.func @transform_5(%arg0: i32) -> (i32, i32) {
    %c0_i32 = arith.constant 0 : i32
    %c0_i32_0 = arith.constant 0 : i32
    %c0_i32_1 = arith.constant 0 : i32
    return %c0_i32, %c0_i32_0 : i32, i32
  }
  func.func @transform_6(%arg0: i32) -> (i32, i32) {
    %c0_i32 = arith.constant 0 : i32
    %c0_i32_0 = arith.constant 0 : i32
    %c0_i32_1 = arith.constant 0 : i32
    return %c0_i32, %c0_i32_0 : i32, i32
  }
}

</mosaic_0001>

<bundles_post_ra>
// kernel: tpu_custom_call.1
= control target key start
LH: loop header
LB: loop body
LE: loop exit
PB: predicated region body
PF: predicated region fallthrough
CT: control target
= control target key end

     0   :  { %12 = vsyncpa [#allocation4], 0  ;;  %s1031_s0 = inlined_call_operand.vmem [shape: f32[16,2], index: 0, kind: input, shape index: {}]   ;;  %s1032_s1 = inlined_call_operand.hbm [shape: f32[16,2,32], index: 1, kind: input, shape index: {}]   ;;  %s1033_s2 = inlined_call_operand.vmem [shape: f32[2,1], index: 2, kind: input, shape index: {}]   ;;  %s1034_s3 = inlined_call_operand.vmem [shape: f32[32,128], index: 3, kind: input, shape index: {}]   ;;  %s1035_s4 = inlined_call_operand.vmem [shape: f32[1,128], index: 4, kind: input, shape index: {}]   ;;  %s1036_s5 = inlined_call_operand.hbm [shape: f32[2,128], index: 5, kind: output, shape index: {0}]   ;;  %s1037_s6 = inlined_call_operand.hbm [shape: f32[2,32], index: 6, kind: output, shape index: {1}]  }
   0x1   :  { %14 = vsyncpa [#allocation4 + $0x1], 0 }
   0x2   :  { %15 = vsyncpa [#allocation5], 0 }
   0x3   :  { %16 = vsyncpa [#allocation8], 0  ;;  %s838_s21 = smov 0   ;;  %s840_s22 = smov 0  }
   0x4   :  { %s842_s23 = smov 0   ;;  %s844_s24 = smov 0  }
   0x5 LB: > { %s857_s25 = sadd.s32 4294967295, %s791_s24   ;;  %s860_s26 = sadd.s32 1, %s791_s24   ;;  %s791_s24 = sphi %s844_s24, %s1044_s24   ;;  %s787_s23 = sphi %s842_s23, %s1043_s23   ;;  %s783_s22 = sphi %s840_s22, %s1042_s22   ;;  %s779_s21 = sphi %s838_s21, %s1041_s21  }
   0x6   : > { %s52_s27 = ssub.s32 %s791_s24, %s860_s26  ;;  %s55_s28 = sadd.s32 1, %s787_s23 }
   0x7   : > { %p53_p0 = scmp.eq.s32.totalorder %s52_s27, 0  ;;  %p62_p1 = scmp.ne.s32.totalorder %s787_s23, %s783_s22 }
   0x8   : > { %p63_p2 = scmp.eq.s32.totalorder %s791_s24, 0  ;;  %p68_p3 = scmp.ne.s32.totalorder %s783_s22, %s779_s21 }
   0x9   : > { %s870_s29 = scalar_select %p53_p0, %s787_s23, %s55_s28  }
   0xa   : > { %p64_p4 = por %p63_p2, %p62_p1  ;;  %p69_p5 = scmp.eq.s32.totalorder %s857_s25, 0 }
   0xb   : > { %p620_p6 = scmp.lt.s32.totalorder %s791_s24, 2  ;;  %s213_s7 = sand.u32 1, %s787_s23  }
   0xc   : > { %p874_p7 = por %p69_p5, %p68_p3  ;;  %s567_s8 = sshll.u32 %s213_s7, 4 }
   0xd   : > { %s583_s9 = sshll.u32 %s791_s24, 8  ;;  %s217_s13 = scalar_lea.vmem [#allocation3], %s567_s8 }
   0xe   : > { %s883_s12 = scalar_lea.hbm %s1032_s1, %s583_s9  ;;  %s224_s14 = sshll.u32 %s217_s13, 4  ;;  %s885_s14 = int_to_ptr.vmem [resolvable:$true] %s224_s14 }
   0xf   : > { %p887_p8 = pnand %p620_p6, %p64_p4  ;;  %s892_s16 = scalar_lea.sflag [#allocation4], %s213_s7 }
  0x10   : > { %s667_s17 = scalar_lea.hbm %s883_s12, 256  ;;  %s672_s20 = scalar_lea.hbm %s1032_s1, 512 }
  0x11   : > { %p668_p10 = scmp.ne.s32.totalorder %s883_s12, %s667_s17  ;;  %p669_p11 = pneg %p887_p8 }
  0x12   : > { %p673_p0 = scmp.lt.u32.totalorder %s883_s12, %s1032_s1  ;;  %p674_p1 = scmp.lt.u32.totalorder %s672_s20, %s667_s17 }
  0x13   : > { %p670_p12 = pnand %p669_p11, %p668_p10  ;;  %p676_p3 = scmp.lt.u32.totalorder %s667_s17, %s883_s12 }
  0x14   : > { %p675_p2 = por %p674_p1, %p673_p0 }
  0x15   : > { %p671_p13 = pneg %p670_p12 }
  0x16   : > { %p677_p4 = por %p676_p3, %p675_p2 }
  0x18   : > { %p678_p5 = pnand %p677_p4, %p671_p13 }
  0x1a   : > { %681 = shalt.err (!%p678_p5)
}
  0x1b   : > { %s682_s28 = scalar_lea.vmem %s885_s14, 256  ;;  %s793_s7 = smov [#allocation3]  }
  0x1c   : > { %p683_p6 = scmp.ne.s32.totalorder %s885_s14, %s682_s28  ;;  %s687_s8 = sshll.u32 %s793_s7, 4  ;;  %s688_s8 = int_to_ptr.vmem [resolvable:$false] %s687_s8 }
  0x1d   : > { %s689_s9 = scalar_lea.vmem %s688_s8, 512  ;;  %p690_p9 = scmp.lt.s32.totalorder %s885_s14, %s688_s8 }
  0x1e   : > { %p685_p10 = pnand %p683_p6, %p669_p11  ;;  %p691_p0 = scmp.lt.s32.totalorder %s689_s9, %s682_s28 }
  0x20   : > { %p686_p12 = pneg %p685_p10  ;;  %p692_p1 = por %p691_p0, %p690_p9 }
  0x22   : > { %p693_p2 = pnand %p692_p1, %p686_p12 }
  0x24   : > { %696 = shalt.err (!%p693_p2)
}
  0x25   : > { %s794_s10 = smov 32   ;;  %s795_s11 = smov 2  }
  0x26   : > { %619 = dma.hbm_to_vmem [thread:$0]  (!%p887_p8), %s883_s12, 256, %s885_s14, %s892_s16, %s794_s10, %s794_s10, %s795_s11  }
  0x27   : > { %p232_p11 = scmp.lt.s32.totalorder %s791_s24, 3  ;;  %p1040_p13 = scmp.ge.s32.totalorder %s791_s24, 1 }
  0x29   : > { %p233_p3 = pnand %p1040_p13, %p232_p11 }
  0x2a   : > { %s238_s13 = sand.u32 (!%p233_p3), 1, %s783_s22  }
  0x2b   : > { %236 = sbr.rel (%p233_p3) target bundleno = 480 (0x1e0), region = 40  ;;  %s571_s17 = sshll.u32 (!%p233_p3), %s238_s13, 4 }
  0x2c   : > { %s239_s18 = scalar_lea.sflag (!%p233_p3), [#allocation4], %s238_s13  ;;  %s924_s19 = scalar_lea.vmem (!%p233_p3), [#allocation3], %s571_s17 }
  0x32   : > { %766 = dma.done.wait (%p874_p7), %s239_s18, 256  }
  0x33   : > { %768 = vsyncadd (%p874_p7), %s239_s18, 4294967040  ;;  %p270_p9 = scmp.lt.s32.totalorder %s857_s25, 1  ;;  %p573_p8 = scmp.ne.s32.totalorder %s857_s25, 0 }
  0x34   : > { %vm279_vm0 = vcmask (!%p573_p8), 254976   ;;  %v796_v0 = vmov (!%p573_p8), 0.0  }
  0x35   : > { %s271_s12 = scalar_select %p270_p9, %s857_s25, 1 }
  0x36   : > { %278 = sbr.rel (%p573_p8) target bundleno = 61 (0x3d), region = 48  ;;  %280 = vst.msk [vmem:[#allocation2] sm:$0x3] (!%p573_p8), %vm279_vm0, %v796_v0 }
  0x37   : > { %s572_s14 = sshll.u32 %s271_s12, 3 }
  0x38   : > { %s273_s16 = scalar_lea.vmem %s1031_s0, %s572_s14 }
  0x3d PF: > { %v281_v1 = vld [vmem:[%s273_s16] sm:$0xff]  ;;  %v292_v2 = vlaneseq  ;;  %v286_v26 = vld [vmem:[%s924_s19 + $0x6] sm:$0x3]  ;;  %vm356_vm1 = vcmask 254976   ;;  %v287_v33 = vld [vmem:[%s924_s19 + $0x8] sm:$0x3] }
  0x3e   : > { %v282_v3 = vsub.f32 1.0, %v281_v1  ;;  %v283_v21 = vld [vmem:[%s924_s19] sm:$0x3]  ;;  %v285_v24 = vld [vmem:[%s924_s19 + $0x4] sm:$0x3]  ;;  %p574_p7 = scmp.ne.s32.totalorder %s857_s25, 1 }
  0x3f   : > { %v293_v4 = vshrl.u32 %v292_v2, 7  ;;  %v284_v25 = vld [vmem:[%s924_s19 + $0x2] sm:$0x3]  ;;  %v288_v34 = vld [vmem:[%s924_s19 + $0xa] sm:$0x3]  ;;  %v797_v1 = vmov (!%p574_p7), 0  }
  0x40   : > { %v289_v45 = vld [vmem:[%s924_s19 + $0xc] sm:$0x3]  ;;  %v290_v46 = vld [vmem:[%s924_s19 + $0xe] sm:$0x3]  ;;  %666 = vset.pattern.permute.xlu0 (!%p574_p7), %v797_v1  ;;  %v798_v2 = vmov (!%p574_p7), 0.0|0.0   ;;  %vm799_vm2 = vmmov (!%p574_p7), 0  }
  0x41   : > { %v294_v5 = vsub.s32 0, %v293_v4  ;;  %v308_v6 = vsub.s32 2, %v293_v4  ;;  %v301_v7 = vsub.s32 1, %v293_v4  ;;  %v315_v8 = vsub.s32 3, %v293_v4  ;;  %v291_v59 = vld [vmem:[#allocation2] sm:$0x3]  ;;  %600 = vmatprep.subr.bf16.mxu0 (!%p574_p7), %v798_v2 }
  0x42   : > { %v322_v13 = vsub.s32 4, %v293_v4  ;;  %v329_v14 = vsub.s32 5, %v293_v4  ;;  %v336_v17 = vsub.s32 6, %v293_v4  ;;  %v343_v18 = vsub.s32 7, %v293_v4  ;;  %v379_v62 = vld [vmem:[%s1033_s2] sm:$0x3] (!%p574_p7) }
  0x43   : > { %v295_v9 = vrot.slane %v282_v3, %v294_v5  ;;  %v309_v10 = vrot.slane %v282_v3, %v308_v6  ;;  %v302_v11 = vrot.slane %v282_v3, %v301_v7  ;;  %v316_v12 = vrot.slane %v282_v3, %v315_v8  ;;  %v387_v63 = vld [vmem:[%s1034_s3] sm:$0xff] (!%p574_p7)  ;;  %v388_v0 = vld [vmem:[%s1034_s3 + $0x8] sm:$0xff] (!%p574_p7)  ;;  %v389_v4 = vld [vmem:[%s1034_s3 + $0x10] sm:$0xff] (!%p574_p7) }
  0x44   : > { %v323_v15 = vrot.slane %v282_v3, %v322_v13  ;;  %v330_v16 = vrot.slane %v282_v3, %v329_v14  ;;  %v337_v19 = vrot.slane %v282_v3, %v336_v17  ;;  %v344_v20 = vrot.slane %v282_v3, %v343_v18  ;;  %v390_v5 = vld [vmem:[%s1034_s3 + $0x18] sm:$0xff] (!%p574_p7) }
  0x45   : > { %297 = vbcast.lane.b32.xlu0 %v295_v9, 256  ;;  %311 = vbcast.lane.b32.xlu1 %v309_v10, 256  ;;  %v601_v3 = vpack.c.bf16 (!%p574_p7), %v388_v0, %v387_v63  ;;  %v604_v6 = vpack.c.bf16 (!%p574_p7), %v390_v5, %v389_v4  ;;  %v800_v7 = vmov (!%p574_p7), 0.0   ;;  %vm398_vm3 = vcmask (!%p574_p7), 261120  }
  0x46   : > { %597 = vmatprep.mubr.msk.f32.mxu0 (!%p574_p7), %vm799_vm2, %v800_v7 }
  0x47   : > { %602 = vmatpush3.bf16.msra.mxu0 (!%p574_p7), %v601_v3 }
  0x48   : > { %603 = vmatprep.subr.bf16.mxu0 (!%p574_p7), %v798_v2 }
  0x49   : > { %304 = vbcast.lane.b32.xlu0 %v302_v11, 256  ;;  %318 = vbcast.lane.b32.xlu1 %v316_v12, 256  ;;  %v575_v11 = vld [vmem:[%s1035_s4] ss:$0 sm:$0xff] (!%p574_p7) }
  0x4b   : > { %605 = vmatpush3.bf16.msra.mxu0 (!%p574_p7), %v604_v6 }
  0x4d   : > { %325 = vbcast.lane.b32.xlu0 %v323_v15, 256  ;;  %332 = vbcast.lane.b32.xlu1 %v330_v16, 256 }
  0x51   : > { %339 = vbcast.lane.b32.xlu0 %v337_v19, 256  ;;  %346 = vbcast.lane.b32.xlu1 %v344_v20, 256 }
  0x55   : > { %382 = vperm.xlu0 (!%p574_p7), %666, %v379_v62  }
  0xb7   : > { %v298_v22 = vpop.permute.xlu0 %297  ;;  %v312_v23 = vpop.permute.xlu1 %311 }
  0xb8   : > { %v348_v27 = vmul.f32 %v298_v22, %v283_v21  ;;  %v350_v30 = vmul.f32 %v312_v23, %v285_v24 }
  0xba   : > { %v357_v35 = vsel %vm356_vm1, %v348_v27, 0.0  ;;  %v360_v40 = vsel %vm356_vm1, %v350_v30, 0.0 }
  0xbb   : > { %v305_v28 = vpop.permute.xlu0 %304  ;;  %v319_v29 = vpop.permute.xlu1 %318 }
  0xbc   : > { %v349_v31 = vmul.f32 %v305_v28, %v284_v25  ;;  %v351_v32 = vmul.f32 %v319_v29, %v286_v26 }
  0xbe   : > { %v358_v36 = vsel %vm356_vm1, %v349_v31, 0.0  ;;  %v362_v41 = vsel %vm356_vm1, %v351_v32, 0.0 }
  0xbf   : > { %v359_v37 = vadd.f32 %v358_v36, %v357_v35  ;;  %v326_v38 = vpop.permute.xlu0 %325  ;;  %v333_v39 = vpop.permute.xlu1 %332 }
  0xc0   : > { %v352_v42 = vmul.f32 %v326_v38, %v287_v33  ;;  %v353_v43 = vmul.f32 %v333_v39, %v288_v34 }
  0xc1   : > { %v361_v44 = vadd.f32 %v360_v40, %v359_v37 }
  0xc2   : > { %v364_v47 = vsel %vm356_vm1, %v352_v42, 0.0  ;;  %v366_v51 = vsel %vm356_vm1, %v353_v43, 0.0 }
  0xc3   : > { %v363_v48 = vadd.f32 %v362_v41, %v361_v44  ;;  %v340_v49 = vpop.permute.xlu0 %339  ;;  %v347_v50 = vpop.permute.xlu1 %346 }
  0xc4   : > { %v354_v52 = vmul.f32 %v340_v49, %v289_v45  ;;  %v355_v53 = vmul.f32 %v347_v50, %v290_v46 }
  0xc5   : > { %v365_v54 = vadd.f32 %v364_v47, %v363_v48 }
  0xc6   : > { %v368_v55 = vsel %vm356_vm1, %v354_v52, 0.0  ;;  %v370_v57 = vsel %vm356_vm1, %v355_v53, 0.0 }
  0xc7   : > { %v367_v56 = vadd.f32 %v366_v51, %v365_v54 }
  0xc9   : > { %v369_v58 = vadd.f32 %v368_v55, %v367_v56  ;;  %377 = sbr.rel (%p574_p7) target bundleno = 432 (0x1b0), region = 52 }
  0xcb   : > { %v371_v60 = vadd.f32 %v370_v57, %v369_v58 }
  0xcd   : > { %v372_v61 = vadd.f32 %v371_v60, %v291_v59 }
  0xcf   : > { %373 = vst.msk [vmem:[#allocation2] sm:$0x3] %vm356_vm1, %v372_v61 }
  0xd4   : > { %v383_v9 = vpop.permute.xlu0 %382 }
  0xd6   : > { %v378_v8 = vld [vmem:[#allocation2] sm:$0x3] }
  0xd7   : > { %v385_v10 = vmul.f32 %v383_v9, %v378_v8 }
  0xd9   : > { %386 = vst.msk [vmem:[#allocation7] sm:$0x3] %vm356_vm1, %v385_v10  ;;  %598 = vmatmul.mubr.msk.f32.vlgmr.msra.gmra.mrb[0].mxu0 %vm398_vm3, %v385_v10 }
 0x1ac   : > { %v468_v12 = vpop.f32.mrb[0].mxu0 }
 0x1ad   : > { %v469_v13 = vadd.f32 %v575_v11, %v468_v12  ;;  %v599_v14 = vpop.f32.mrb[1].mxu0 }
 0x1af   : > { %472 = vst [vmem:[#allocation6] sm:$0x3] %v469_v13 }
 0x1b0 PF: > { %p621_p4 = scmp.eq.s32.totalorder %s857_s25, 1  ;;  %s801_s18 = smov [#allocation6]  }
 0x1b1   : > { %s480_s19 = sshll.u32 %s801_s18, 4  ;;  %s802_s12 = smov [#allocation7]   ;;  %s481_s19 = int_to_ptr.vmem [resolvable:$true] %s480_s19 }
 0x1b2   : > { %s491_s14 = sshll.u32 %s802_s12, 4  ;;  %s697_s24 = scalar_lea.vmem %s481_s19, 32  ;;  %s492_s14 = int_to_ptr.vmem [resolvable:$true] %s491_s14 }
 0x1b3   : > { %p698_p5 = scmp.ne.s32.totalorder %s481_s19, %s697_s24  ;;  %p704_p12 = scmp.lt.s32.totalorder %s481_s19, %s481_s19 }
 0x1b4   : > { %p705_p0 = scmp.lt.s32.totalorder %s697_s24, %s697_s24 }
 0x1b5   : > { %p699_p6 = pnand %p698_p5, %p621_p4 }
 0x1b6   : > { %p706_p1 = por %p705_p0, %p704_p12 }
 0x1b7   : > { %p700_p10 = pneg %p699_p6 }
 0x1b9   : > { %p707_p2 = pnand %p706_p1, %p700_p10 }
 0x1bb   : > { %710 = shalt.err (!%p707_p2)
}
 0x1bc   : > { %s711_s30 = scalar_lea.hbm %s1036_s5, 32 }
 0x1bd   : > { %p712_p11 = scmp.ne.s32.totalorder %s1036_s5, %s711_s30  ;;  %p717_p9 = scmp.lt.u32.totalorder %s711_s30, %s1036_s5 }
 0x1bf   : > { %p713_p13 = pnand %p712_p11, %p621_p4 }
 0x1c1   : > { %p714_p3 = pneg %p713_p13 }
 0x1c3   : > { %p719_p8 = pnand %p717_p9, %p714_p3 }
 0x1c5   : > { %722 = shalt.err (!%p719_p8)
}
 0x1c6   : > { %609 = dma.vmem_to_hbm [thread:$0]  (%p621_p4), %s481_s19, 32, %s1036_s5, [#allocation5]  }
 0x1c7   : > { %s723_s9 = scalar_lea.vmem %s492_s14, 32  ;;  %p730_p10 = scmp.lt.s32.totalorder %s492_s14, %s492_s14 }
 0x1c8   : > { %p724_p7 = scmp.ne.s32.totalorder %s492_s14, %s723_s9  ;;  %p731_p12 = scmp.lt.s32.totalorder %s723_s9, %s723_s9 }
 0x1ca   : > { %p725_p5 = pnand %p724_p7, %p621_p4  ;;  %p732_p0 = por %p731_p12, %p730_p10 }
 0x1cc   : > { %p726_p6 = pneg %p725_p5 }
 0x1ce   : > { %p733_p1 = pnand %p732_p0, %p726_p6 }
 0x1d0   : > { %736 = shalt.err (!%p733_p1)
}
 0x1d1   : > { %s737_s13 = scalar_lea.hbm %s1037_s6, 32 }
 0x1d2   : > { %p738_p2 = scmp.ne.s32.totalorder %s1037_s6, %s737_s13  ;;  %p743_p3 = scmp.lt.u32.totalorder %s737_s13, %s1037_s6 }
 0x1d4   : > { %p739_p11 = pnand %p738_p2, %p621_p4 }
 0x1d6   : > { %p740_p13 = pneg %p739_p11 }
 0x1d8   : > { %p745_p9 = pnand %p743_p3, %p740_p13 }
 0x1da   : > { %748 = shalt.err (!%p745_p9)
}
 0x1db   : > { %611 = dma.vmem_to_hbm [thread:$0]  (%p621_p4), %s492_s14, 32, %s1037_s6, [#allocation8]  }
 0x1dc   : > { %770 = dma.done.wait (%p621_p4), [#allocation5], 32  }
 0x1dd   : > { %772 = vsyncadd (%p621_p4), [#allocation5], 4294967264 }
 0x1de   : > { %774 = dma.done.wait (%p621_p4), [#allocation8], 32  }
 0x1df   : > { %776 = vsyncadd (%p621_p4), [#allocation8], 4294967264 }
 0x1e0 PF: > { %p19_p8 = scmp.ge.s32.totalorder %s860_s26, 4   ;;  %s1041_s21 = smov %s783_s22 }
 0x1e1   : > { %s1042_s22 = smov %s787_s23  ;;  %s1043_s23 = smov %s870_s29 }
 0x1e2   : > { %s1044_s24 = smov %s860_s26  ;;  %21 = sbr.rel (!%p19_p8) target bundleno = 5 (0x5), region = 96 }
 0x1e9   :  { %508 = vsyncpa [#allocation4], 1 }
 0x1ea   :  { %510 = vsyncpa [#allocation4 + $0x1], 1 }
 0x1eb   :  { %511 = vsyncpa [#allocation5], 1 }
 0x1ec   :  { %513 = vsyncpa [#allocation5 + $0x1], 1 }
 0x1ed   :  { %514 = vsyncpa [#allocation8], 1 }

</bundles_post_ra>
